<compile_context>
chip_gen: v7x
topology: tpu7x:2x2x1
jax: 0.10.0
libtpu: 0.0.40
codegen_flags: <defaults>
</compile_context>

<pallas_src>
import functools
import math

import jax
import jax.numpy as jnp
from jax import lax
from jax.experimental import pallas as pl
from jax.experimental.pallas import tpu as pltpu

_NEG_INF = -1e30


# --------------------------------------------------------------------------- #
# VMEM budgeting (generation aware)
# --------------------------------------------------------------------------- #
def _vmem_capacity_bytes():
    """Physical VMEM per core; conservative (v7x-sized) fallback if query fails."""
    try:
        cap = int(pltpu.get_tpu_info().vmem_capacity_bytes)
        if cap > 0:
            return cap
    except Exception:
        pass
    return 64 << 20


def _vmem_limit(est_bytes, cap_bytes):
    """Scoped-VMEM limit: estimate (already incl. double-buffering) + headroom,
    capped at ~75% of physical capacity."""
    return int(min(max(est_bytes + (4 << 20), 16 << 20), int(cap_bytes * 0.75)))


def _divisor_tiles(hw_pad):
    """All multiples of 128 that divide hw_pad (ascending)."""
    return [c for c in range(128, hw_pad + 1, 128) if hw_pad % c == 0]


def _est_stage1(tp, cin, ppad):
    io = tp * cin * 2 + cin * 3 * ppad * 2 + 3 * tp * ppad * 2     # bf16 in/out tiles
    tmp = tp * 3 * ppad * 4                                        # f32 matmul result
    return 2 * io + tmp                                            # 2x = double buffering


def _est_stage2(tq, tk, cin, ppad):
    io = (tq * ppad * 2 + 2 * tk * ppad * 2 + 8 * tk * 4           # theta, phi, g, key bias
          + cin * tq * 4 + cin * ppad * 2 + cin * 128 * 4          # residual, wz, bn bias
          + cin * tq * 4)                                          # output tile
    scratch = tq * ppad * 4 + 2 * tq * 128 * 4                     # acc + m/l (lane padded)
    tmp = 3 * tq * tk * 4                                          # s / probs temporaries
    return 2 * io + scratch + tmp


# --------------------------------------------------------------------------- #
# Stage 1: stacked theta / phi / g projections (1x1 convs)
# --------------------------------------------------------------------------- #
def _proj_kernel(x_ref, w_ref, t_ref, p_ref, g_ref, *, ppad):
    """One (batch, HW-tile): (tp, Cin) x (Cin, 3*Ppad) -> theta/phi/g tiles.

    Outputs land directly in the (T, Ppad) layout stage 2 consumes; no in-kernel
    transposes, all matmul operands bf16 with f32 accumulation.
    """
    tpg = jnp.dot(x_ref[0], w_ref[...], preferred_element_type=jnp.float32)
    t_ref[0] = tpg[:, :ppad].astype(jnp.bfloat16)
    p_ref[0] = tpg[:, ppad:2 * ppad].astype(jnp.bfloat16)
    g_ref[0] = tpg[:, 2 * ppad:].astype(jnp.bfloat16)


# --------------------------------------------------------------------------- #
# Stage 2: softmax attention fused with z conv + folded BN + residual
# --------------------------------------------------------------------------- #
def _attn_kernel(t_ref, p_ref, g_ref, kb_ref, xres_ref, wz_ref, bnb_ref,
                 out_ref, *scratch, need_mask, single_pass):
    def epilogue(y):
        # y: (TQ, Ppad) f32, softmax-normalized attention output.
        z = jnp.dot(wz_ref[...], y.astype(jnp.bfloat16).T,
                    preferred_element_type=jnp.float32)            # (Cin, TQ)
        out_ref[0] = z + bnb_ref[...] + xres_ref[0]                # folded BN + residual

    # s = theta_tile @ phi_tile^T, contracting over the (zero-padded) projection dim.
    s = lax.dot_general(t_ref[0], p_ref[0], (((1,), (1,)), ((), ())),
                        preferred_element_type=jnp.float32)        # (TQ, TK) f32
    if need_mask:
        s = s + kb_ref[...]                                        # additive 0 / -1e30 row

    if single_pass:
        # Whole key axis in one tile: plain softmax, no online rescaling.
        m = jnp.max(s, axis=1, keepdims=True)
        probs = jnp.exp(s - m)
        l = jnp.sum(probs, axis=1, keepdims=True)
        y = jnp.dot(probs.astype(jnp.bfloat16), g_ref[0],
                    preferred_element_type=jnp.float32)
        epilogue(y * pl.reciprocal(l, approx=True))
        return

    m_ref, l_ref, acc_ref = scratch
    ki = pl.program_id(2)

    @pl.when(ki == 0)
    def _():
        m_ref[...] = jnp.full_like(m_ref, _NEG_INF)
        l_ref[...] = jnp.zeros_like(l_ref)
        acc_ref[...] = jnp.zeros_like(acc_ref)

    m_prev = m_ref[...]
    m_new = jnp.maximum(m_prev, jnp.max(s, axis=1, keepdims=True))
    alpha = jnp.exp(m_prev - m_new)
    probs = jnp.exp(s - m_new)
    l_ref[...] = alpha * l_ref[...] + jnp.sum(probs, axis=1, keepdims=True)
    acc_ref[...] = alpha * acc_ref[...] + jnp.dot(
        probs.astype(jnp.bfloat16), g_ref[0], preferred_element_type=jnp.float32)
    m_ref[...] = m_new

    @pl.when(ki == pl.num_programs(2) - 1)
    def _():
        epilogue(acc_ref[...] * pl.reciprocal(l_ref[...], approx=True))


# --------------------------------------------------------------------------- #
# Wrapper
# --------------------------------------------------------------------------- #
def spatial_nl(x_nchw, wt, wp, wg, wz, bn_gamma, bn_beta, bn_mean, bn_var,
               *, use_scale=False, eps=1e-5,
               tile_q=None, tile_k=None, tile_proj=None):
    """SpatialNL forward.

    x_nchw: (B, Cin, H, W) f32
    wt/wp/wg: (P, Cin)   1x1 conv weights (kernel dims squeezed)
    wz: (Cin, P)         1x1 conv weight (planes -> inplanes)
    bn_*: (Cin,)         BatchNorm2d affine + running stats (inference mode)
    tile_*: optional overrides (multiples of 128 dividing HW_pad); auto-chosen
            from the device VMEM budget when None.
    """
    B, Cin, H, W = x_nchw.shape
    P = wt.shape[0]
    HW = H * W
    HW_pad = pl.cdiv(HW, 128) * 128
    Ppad = pl.cdiv(P, 128) * 128          # lane-dense projection dim (full MXU K/N)

    cap = _vmem_capacity_bytes()
    budget = int(cap * 0.45)              # working-set target; leaves pipeline headroom
    tiles = _divisor_tiles(HW_pad)

    # ---- tile selection (largest tiles that fit the budget) ---------------
    tp_auto = 128
    for c in tiles:
        if _est_stage1(c, Cin, Ppad) <= budget:
            tp_auto = c
    tq_auto, tk_auto = 128, 128
    # Prefer the largest query tile (key re-streaming ~ HW_pad/tq), then the
    # largest key tile (tk == HW_pad -> single-pass softmax, no rescaling).
    for cq in reversed(tiles):
        chosen = None
        for ck in reversed(tiles):
            if _est_stage2(cq, ck, Cin, Ppad) <= budget:
                chosen = ck
                break
        if chosen is not None:
            tq_auto, tk_auto = cq, chosen
            break
    tp = tile_proj if tile_proj is not None else tp_auto
    tq = tile_q if tile_q is not None else tq_auto
    tk = tile_k if tile_k is not None else tk_auto
    for name, t in (("tile_proj", tp), ("tile_q", tq), ("tile_k", tk)):
        if t % 128 != 0 or HW_pad % t != 0:
            raise ValueError(f"{name}={t} must be a multiple of 128 dividing {HW_pad}")

    # ---- operand preparation (one-time XLA relayouts / weight folding) ----
    xf = x_nchw.reshape(B, Cin, HW).astype(jnp.float32)
    if HW_pad != HW:
        xf = jnp.pad(xf, ((0, 0), (0, 0), (0, HW_pad - HW)))
    # Spatial-major bf16 copy for the projections (no per-tile XLU transposes,
    # half the stage-1 input DMA).  f32 copy kept only for the residual add.
    xT = jnp.transpose(xf, (0, 2, 1)).astype(jnp.bfloat16)          # (B, HW_pad, Cin)

    scale = (1.0 / math.sqrt(P)) if use_scale else 1.0

    def _pad_rows(w):
        return jnp.pad(w, ((0, Ppad - P), (0, 0)))

    # Fold the softmax scale into theta, stack theta/phi/g, pad the projection dim.
    w_stacked = jnp.concatenate(
        [_pad_rows(wt.astype(jnp.float32) * scale),
         _pad_rows(wp.astype(jnp.float32)),
         _pad_rows(wg.astype(jnp.float32))], axis=0)                # (3*Ppad, Cin)
    w_stackedT = jnp.transpose(w_stacked).astype(jnp.bfloat16)      # (Cin, 3*Ppad)

    # Inference-mode BatchNorm folded into wz (scale) and a per-channel bias.
    inv_std = 1.0 / jnp.sqrt(bn_var.astype(jnp.float32) + eps)
    bn_scale = bn_gamma.astype(jnp.float32) * inv_std
    bn_bias = (bn_beta.astype(jnp.float32)
               - bn_mean.astype(jnp.float32) * bn_scale).reshape(Cin, 1)
    wz_scaled = wz.astype(jnp.float32) * bn_scale[:, None]          # (Cin, P)
    wz_scaled = jnp.pad(wz_scaled, ((0, 0), (0, Ppad - P))).astype(jnp.bfloat16)

    # Additive key mask row: 0 for real columns, -1e30 for padded ones.
    need_mask = HW_pad != HW
    col = jnp.arange(HW_pad)
    kbias = jnp.where(col < HW, 0.0, _NEG_INF).astype(jnp.float32).reshape(1, HW_pad)

    # ---------------- Stage 1: projections ----------------
    n_hw = HW_pad // tp
    est1 = _est_stage1(tp, Cin, Ppad)
    t_a, p_a, g_a = pl.pallas_call(
        functools.partial(_proj_kernel, ppad=Ppad),
        out_shape=(jax.ShapeDtypeStruct((B, HW_pad, Ppad), jnp.bfloat16),
                   jax.ShapeDtypeStruct((B, HW_pad, Ppad), jnp.bfloat16),
                   jax.ShapeDtypeStruct((B, HW_pad, Ppad), jnp.bfloat16)),
        grid=(B, n_hw),
        in_specs=[
            pl.BlockSpec((1, tp, Cin), lambda b, i: (b, i, 0)),
            pl.BlockSpec((Cin, 3 * Ppad), lambda b, i: (0, 0)),
        ],
        out_specs=(
            pl.BlockSpec((1, tp, Ppad), lambda b, i: (b, i, 0)),
            pl.BlockSpec((1, tp, Ppad), lambda b, i: (b, i, 0)),
            pl.BlockSpec((1, tp, Ppad), lambda b, i: (b, i, 0)),
        ),
        compiler_params=pltpu.CompilerParams(
            dimension_semantics=("parallel", "parallel"),
            vmem_limit_bytes=_vmem_limit(est1, cap)),
    )(xT, w_stackedT)

    # ---------------- Stage 2: attention + z + BN + residual ----------------
    n_q = HW_pad // tq
    n_k = HW_pad // tk
    single_pass = n_k == 1
    est2 = _est_stage2(tq, tk, Cin, Ppad)

    scratch_shapes = [] if single_pass else [
        pltpu.VMEM((tq, 1), jnp.float32),     # running max m
        pltpu.VMEM((tq, 1), jnp.float32),     # running denom l
        pltpu.VMEM((tq, Ppad), jnp.float32),  # output accumulator
    ]

    out = pl.pallas_call(
        functools.partial(_attn_kernel, need_mask=need_mask, single_pass=single_pass),
        out_shape=jax.ShapeDtypeStruct((B, Cin, HW_pad), jnp.float32),
        grid=(B, n_q, n_k),
        in_specs=[
            pl.BlockSpec((1, tq, Ppad), lambda b, q, k: (b, q, 0)),   # theta (query tile)
            pl.BlockSpec((1, tk, Ppad), lambda b, q, k: (b, k, 0)),   # phi   (key tile)
            pl.BlockSpec((1, tk, Ppad), lambda b, q, k: (b, k, 0)),   # g     (key tile)
            pl.BlockSpec((1, tk), lambda b, q, k: (0, k)),            # additive key mask
            pl.BlockSpec((1, Cin, tq), lambda b, q, k: (b, 0, q)),    # residual x (f32)
            pl.BlockSpec((Cin, Ppad), lambda b, q, k: (0, 0)),        # wz (BN-scale folded)
            pl.BlockSpec((Cin, 1), lambda b, q, k: (0, 0)),           # BN bias
        ],
        out_specs=pl.BlockSpec((1, Cin, tq), lambda b, q, k: (b, 0, q)),
        scratch_shapes=scratch_shapes,
        compiler_params=pltpu.CompilerParams(
            dimension_semantics=("parallel", "parallel", "arbitrary"),
            vmem_limit_bytes=_vmem_limit(est2, cap)),
    )(t_a, p_a, g_a, kbias, xf, wz_scaled, bn_bias)

    return out[:, :, :HW].reshape(B, Cin, H, W)


# --------------------------------------------------------------------------- #
# Pure-JAX reference (inference-mode BN), mirrors the PyTorch forward
# --------------------------------------------------------------------------- #
def spatial_nl_ref(x_nchw, wt, wp, wg, wz, bn_gamma, bn_beta, bn_mean, bn_var,
                   *, use_scale=False, eps=1e-5):
    B, Cin, H, W = x_nchw.shape
    P = wt.shape[0]
    HW = H * W
    xf = x_nchw.reshape(B, Cin, HW)

    t = jnp.einsum('pc,bcs->bps', wt, xf)                 # (B, P, HW)
    p = jnp.einsum('pc,bcs->bps', wp, xf)                 # (B, P, HW)
    g = jnp.einsum('pc,bcs->bps', wg, xf)                 # (B, P, HW)

    att = jnp.einsum('bpq,bpk->bqk', t, p)                # (B, HW, HW)  (= t^T p)
    if use_scale:
        att = att / (P ** 0.5)
    att = jax.nn.softmax(att, axis=2)
    y = jnp.einsum('bqk,bpk->bpq', att, g)                # (B, P, HW)
    z = jnp.einsum('cp,bps->bcs', wz, y)                  # (B, Cin, HW)

    inv_std = 1.0 / jnp.sqrt(bn_var + eps)
    zn = (z - bn_mean[None, :, None]) * inv_std[None, :, None]
    zn = zn * bn_gamma[None, :, None] + bn_beta[None, :, None]
    return (zn + xf).reshape(B, Cin, H, W)


if __name__ == "__main__":
    # Small shapes consistent with the module: inplanes=16, planes=8, 12x12 spatial
    # (HW=144 -> padded to 256, exercising the additive key mask; P=8 -> padded to 128).
    B, Cin, P, H, W = 2, 16, 8, 12, 12

    key = jax.random.PRNGKey(0)
    ks = jax.random.split(key, 9)
    x = jax.random.normal(ks[0], (B, Cin, H, W), jnp.float32)
    wt = 0.1 * jax.random.normal(ks[1], (P, Cin), jnp.float32)
    wp = 0.1 * jax.random.normal(ks[2], (P, Cin), jnp.float32)
    wg = 0.1 * jax.random.normal(ks[3], (P, Cin), jnp.float32)
    wz = 0.1 * jax.random.normal(ks[4], (Cin, P), jnp.float32)
    bn_gamma = 1.0 + 0.1 * jax.random.normal(ks[5], (Cin,), jnp.float32)
    bn_beta = 0.1 * jax.random.normal(ks[6], (Cin,), jnp.float32)
    bn_mean = 0.1 * jax.random.normal(ks[7], (Cin,), jnp.float32)
    bn_var = 0.5 + jnp.abs(jax.random.normal(ks[8], (Cin,), jnp.float32))

    for use_scale in (False, True):
        ref = jax.block_until_ready(
            spatial_nl_ref(x, wt, wp, wg, wz, bn_gamma, bn_beta, bn_mean, bn_var,
                           use_scale=use_scale))
        # Auto tiles -> single-pass softmax path; forced 128 tiles -> online-softmax path.
        for tiles in ({}, {"tile_q": 128, "tile_k": 128, "tile_proj": 128}):
            out = spatial_nl(x, wt, wp, wg, wz, bn_gamma, bn_beta, bn_mean, bn_var,
                             use_scale=use_scale, **tiles)
            out = jax.block_until_ready(out)
            assert out.shape == (B, Cin, H, W)
            err = float(jnp.max(jnp.abs(out - ref)))
            assert err < 2e-2, (
                f"mismatch vs reference (use_scale={use_scale}, tiles={tiles}): {err}")

    print("KERNEL_OK")
</pallas_src>

<mosaic_0001>
module attributes {stable_mosaic.version = 11 : i64} {
  func.func @_proj_kernel(%arg0: i32, %arg1: i32, %arg2: memref<1x256x16xbf16, #tpu.memory_space<vmem>>, %arg3: memref<16x384xbf16, #tpu.memory_space<vmem>>, %arg4: memref<1x256x128xbf16, #tpu.memory_space<vmem>>, %arg5: memref<1x256x128xbf16, #tpu.memory_space<vmem>>, %arg6: memref<1x256x128xbf16, #tpu.memory_space<vmem>>) attributes {dimension_semantics = [#tpu.dimension_semantics<parallel>, #tpu.dimension_semantics<parallel>], iteration_bounds = array<i64: 2, 1>, scalar_prefetch = 0 : i64, scratch_operands = 0 : i64, tpu.core_type = #tpu.core_type<tc>, window_params = [{transform_indices = @transform_0, window_bounds = array<i64: 1, 256, 16>}, {pipeline_mode = #tpu.pipeline_mode<synchronous>, transform_indices = @transform_1, window_bounds = array<i64: 16, 384>}, {transform_indices = @transform_2, window_bounds = array<i64: 1, 256, 128>}, {transform_indices = @transform_3, window_bounds = array<i64: 1, 256, 128>}, {transform_indices = @transform_4, window_bounds = array<i64: 1, 256, 128>}]} {
    %c0 = arith.constant 0 : index
    %c0_0 = arith.constant 0 : index
    %c0_1 = arith.constant 0 : index
    %0 = vector.load %arg2[%c0, %c0_0, %c0_1] : memref<1x256x16xbf16, #tpu.memory_space<vmem>>, vector<1x256x16xbf16>
    %1 = vector.shape_cast %0 : vector<1x256x16xbf16> to vector<256x16xbf16>
    %c0_2 = arith.constant 0 : index
    %c0_3 = arith.constant 0 : index
    %2 = vector.load %arg3[%c0_2, %c0_3] : memref<16x384xbf16, #tpu.memory_space<vmem>>, vector<16x384xbf16>
    %cst = arith.constant dense<0.000000e+00> : vector<256x384xf32>
    %3 = tpu.matmul %1, %2, %cst {dimension_numbers = #tpu.dot_dimension_numbers<[1], [0], [0], [1], [0, 0, 1, 1], [], []>} : vector<256x16xbf16>, vector<16x384xbf16>, vector<256x384xf32> -> vector<256x384xf32>
    %4 = vector.extract_strided_slice %3 {offsets = [0, 0], sizes = [256, 128], strides = [1, 1]} : vector<256x384xf32> to vector<256x128xf32>
    %5 = arith.truncf %4 : vector<256x128xf32> to vector<256x128xbf16>
    %c0_4 = arith.constant 0 : index
    %c0_5 = arith.constant 0 : index
    %c0_6 = arith.constant 0 : index
    %6 = vector.load %arg4[%c0_4, %c0_5, %c0_6] : memref<1x256x128xbf16, #tpu.memory_space<vmem>>, vector<1x256x128xbf16>
    %7 = vector.shape_cast %6 : vector<1x256x128xbf16> to vector<256x128xbf16>
    %8 = vector.shape_cast %5 : vector<256x128xbf16> to vector<1x256x128xbf16>
    tpu.vector_store %arg4[%c0_4, %c0_5, %c0_6], %8 {strides = array<i32>} : memref<1x256x128xbf16, #tpu.memory_space<vmem>>, vector<1x256x128xbf16>,
    %9 = vector.extract_strided_slice %3 {offsets = [0, 128], sizes = [256, 128], strides = [1, 1]} : vector<256x384xf32> to vector<256x128xf32>
    %10 = arith.truncf %9 : vector<256x128xf32> to vector<256x128xbf16>
    %c0_7 = arith.constant 0 : index
    %c0_8 = arith.constant 0 : index
    %c0_9 = arith.constant 0 : index
    %11 = vector.load %arg5[%c0_7, %c0_8, %c0_9] : memref<1x256x128xbf16, #tpu.memory_space<vmem>>, vector<1x256x128xbf16>
    %12 = vector.shape_cast %11 : vector<1x256x128xbf16> to vector<256x128xbf16>
    %13 = vector.shape_cast %10 : vector<256x128xbf16> to vector<1x256x128xbf16>
    tpu.vector_store %arg5[%c0_7, %c0_8, %c0_9], %13 {strides = array<i32>} : memref<1x256x128xbf16, #tpu.memory_space<vmem>>, vector<1x256x128xbf16>,
    %14 = vector.extract_strided_slice %3 {offsets = [0, 256], sizes = [256, 128], strides = [1, 1]} : vector<256x384xf32> to vector<256x128xf32>
    %15 = arith.truncf %14 : vector<256x128xf32> to vector<256x128xbf16>
    %c0_10 = arith.constant 0 : index
    %c0_11 = arith.constant 0 : index
    %c0_12 = arith.constant 0 : index
    %16 = vector.load %arg6[%c0_10, %c0_11, %c0_12] : memref<1x256x128xbf16, #tpu.memory_space<vmem>>, vector<1x256x128xbf16>
    %17 = vector.shape_cast %16 : vector<1x256x128xbf16> to vector<256x128xbf16>
    %18 = vector.shape_cast %15 : vector<256x128xbf16> to vector<1x256x128xbf16>
    tpu.vector_store %arg6[%c0_10, %c0_11, %c0_12], %18 {strides = array<i32>} : memref<1x256x128xbf16, #tpu.memory_space<vmem>>, vector<1x256x128xbf16>,
    return
  }
  func.func @transform_0(%arg0: i32, %arg1: i32) -> (i32, i32, i32) {
    %c0_i32 = arith.constant 0 : i32
    %c0_i32_0 = arith.constant 0 : i32
    return %arg0, %arg1, %c0_i32 : i32, i32, i32
  }
  func.func @transform_1(%arg0: i32, %arg1: i32) -> (i32, i32) {
    %c0_i32 = arith.constant 0 : i32
    %c0_i32_0 = arith.constant 0 : i32
    %c0_i32_1 = arith.constant 0 : i32
    return %c0_i32, %c0_i32_0 : i32, i32
  }
  func.func @transform_2(%arg0: i32, %arg1: i32) -> (i32, i32, i32) {
    %c0_i32 = arith.constant 0 : i32
    %c0_i32_0 = arith.constant 0 : i32
    return %arg0, %arg1, %c0_i32 : i32, i32, i32
  }
  func.func @transform_3(%arg0: i32, %arg1: i32) -> (i32, i32, i32) {
    %c0_i32 = arith.constant 0 : i32
    %c0_i32_0 = arith.constant 0 : i32
    return %arg0, %arg1, %c0_i32 : i32, i32, i32
  }
  func.func @transform_4(%arg0: i32, %arg1: i32) -> (i32, i32, i32) {
    %c0_i32 = arith.constant 0 : i32
    %c0_i32_0 = arith.constant 0 : i32
    return %arg0, %arg1, %c0_i32 : i32, i32, i32
  }
}

</mosaic_0001>

<bundles_post_ra>
// kernel: tpu_custom_call.1
= control target key start
LH: loop header
LB: loop body
LE: loop exit
PB: predicated region body
PF: predicated region fallthrough
CT: control target
= control target key end

     0   :  { %s2676_s0 = inlined_call_operand.vmem [shape: bf16[2,256,16], index: 0, kind: input, shape index: {}]   ;;  %s2677_s1 = inlined_call_operand.vmem [shape: bf16[16,384], index: 1, kind: input, shape index: {}]   ;;  %s2678_s2 = inlined_call_operand.hbm [shape: bf16[2,256,128], index: 2, kind: output, shape index: {0}]   ;;  %s2679_s3 = inlined_call_operand.hbm [shape: bf16[2,256,128], index: 3, kind: output, shape index: {1}]   ;;  %s2680_s4 = inlined_call_operand.hbm [shape: bf16[2,256,128], index: 4, kind: output, shape index: {2}]  }
   0x1   :  { %2682 = sst [smem:[#allocation9_spill]] %s2676_s0 }
   0x2   :  { %10 = vsyncpa [#allocation3], 0 }
   0x3   :  { %12 = vsyncpa [#allocation3 + $0x1], 0 }
   0x4   :  { %13 = vsyncpa [#allocation5], 0 }
   0x5   :  { %15 = vsyncpa [#allocation5 + $0x1], 0  ;;  %s2340_s15 = smov 0   ;;  %s2342_s16 = smov 0  }
   0x6   :  { %s2344_s17 = smov 0   ;;  %s2346_s18 = smov 0  }
   0x7   :  { %s2348_s19 = smov 0   ;;  %s2350_s20 = smov 0  }
   0x8 LB: > { %s1475_s21 = sadd.s32 4294967295, %s2307_s20   ;;  %s2681_s22 = sadd.s32 4294967294, %s2307_s20   ;;  %s2307_s20 = sphi %s2350_s20, %s21_s20   ;;  %s2303_s19 = sphi %s2348_s19, %s2691_s19   ;;  %s2299_s18 = sphi %s2346_s18, %s2690_s18   ;;  %s2295_s17 = sphi %s2344_s17, %s2689_s17   ;;  %s2291_s16 = sphi %s2342_s16, %s2688_s16   ;;  %s2287_s15 = sphi %s2340_s15, %s2687_s15  }
   0x9   : > { %s33_s23 = sadd.s32 1, %s2303_s19  ;;  %s91_s24 = sadd.s32 1, %s2295_s17 }
   0xa   : > { %p35_p0 = scmp.ge.s32.totalorder %s33_s23, 2  ;;  %p101_p1 = scmp.ne.s32.totalorder %s2295_s17, %s2291_s16 }
   0xb   : > { %p102_p2 = scmp.eq.s32.totalorder %s1475_s21, 1  ;;  %p107_p3 = scmp.ne.s32.totalorder %s2291_s16, %s2287_s15 }
   0xc   : > { %s2693_s23 = smov (%p35_p0, %s33_s23), 0  ;;  %p108_p5 = scmp.eq.s32.totalorder %s2681_s22, 1 }
   0xd   : > { %p2382_p4 = por %p102_p2, %p101_p1  ;;  %s86_s26 = ssub.s32 %s2303_s19, %s2693_s23 }
   0xe   : > { %p1479_p6 = scmp.ge.s32.totalorder %s2307_s20, 1  ;;  %p89_p7 = scmp.eq.s32.totalorder %s86_s26, 0 }
   0xf   : > { %p2391_p8 = por %p108_p5, %p107_p3  ;;  %p198_p9 = scmp.lt.s32.totalorder %s2307_s20, 3 }
  0x10   : > { %s2397_s28 = scalar_select %p89_p7, %s2295_s17, %s91_s24  }
  0x11   : > { %p199_p10 = pnand %p1479_p6, %p198_p9 }
  0x12   : > { %v2149_v0 = vld [vmem:[%s2677_s1 + $0x4] ss:$12 sps:$4 sm:$0xff] (!%p199_p10)   ;;  %p239_p11 = scmp.lt.s32.totalorder (!%p199_p10), %s2299_s18, 1  ;;  %v2151_v1 = vld [vmem:[%s2677_s1] ss:$12 sps:$4 sm:$0xff] (!%p199_p10)   ;;  %v2309_v2 = vmov (!%p199_p10), 0  }
  0x13   : > { %202 = sbr.rel (%p199_p10) target bundleno = 402 (0x192), region = 28  ;;  %465 = vmatprep.mubr.bf16.mxu0 (!%p199_p10), %v2309_v2  ;;  %585 = vmatprep.mubr.bf16.mxu1 (!%p199_p10), %v2309_v2  ;;  %v2154_v3 = vld [vmem:[%s2677_s1 + $0x8] ss:$12 sps:$4 sm:$0xff] (!%p199_p10)   ;;  %s2685_s0 = sld [smem:[#allocation9_spill]] (!%p199_p10)  ;;  %vm384_vm0 = vcmask (!%p199_p10), 130048  }
  0x14   : > { %433 = vmatprep.subr.bf16.mxu0 (!%p199_p10), %v2149_v0  ;;  %2079 = vmatprep.subr.bf16.mxu1 (!%p199_p10), %v2149_v0  ;;  %s221_s14 = sand.u32 (!%p199_p10), 1, %s2291_s16   ;;  %s2536_s5 = sand.u32 (!%p199_p10), 1, %s1475_s21  }
  0x15   : > { %434 = vmatpush1.bf16.msra.mxu0 (!%p199_p10), %v2151_v1  ;;  %2080 = vmatpush1.bf16.msra.mxu1 (!%p199_p10), %v2151_v1  ;;  %s2482_s24 = sshll.u32 (!%p199_p10), %s221_s14, 7  ;;  %s1740_s6 = sshll.u32 (!%p199_p10), %s2299_s18, 11 }
  0x16   : > { %2045 = vmatprep.subr.bf16.mxu1 (!%p199_p10), %v2154_v3  ;;  %s2485_s26 = scalar_lea.vmem (!%p199_p10), [#allocation2], %s2482_s24  ;;  %s2490_s29 = scalar_lea.vmem (!%p199_p10), [#allocation4], %s2482_s24 }
  0x17   : > { %s2508_s30 = scalar_lea.vmem (!%p199_p10), [#allocation6], %s2482_s24  ;;  %s1311_s8 = sshll.u32 (!%p199_p10), %s2490_s29, 4  ;;  %s2557_s8 = int_to_ptr.vmem [resolvable:$true] %s1311_s8 }
  0x18   : > { %s1329_s9 = sshll.u32 (!%p199_p10), %s2508_s30, 4  ;;  %s2548_s11 = scalar_lea.hbm (!%p199_p10), %s2678_s2, %s1740_s6  ;;  %s2565_s9 = int_to_ptr.vmem [resolvable:$true] %s1329_s9 }
  0x19   : > { %s2571_s22 = scalar_lea.sflag (!%p199_p10), [#allocation3], %s221_s14  ;;  %s2310_s12 = smov (!%p199_p10), [#allocation2]  }
  0x1a   : > { %s240_s7 = scalar_select %p239_p11, %s2299_s18, 1 }
  0x1c   : > { %s1643_s10 = sshll.u32 %s240_s7, 7  ;;  %s1293_s7 = sshll.u32 %s2485_s26, 4  ;;  %s2550_s7 = int_to_ptr.vmem [resolvable:$true] %s1293_s7 }
  0x1d   : > { %s2415_s13 = scalar_lea.vmem %s2685_s0, %s1643_s10  ;;  %s2563_s10 = scalar_lea.hbm %s2680_s4, %s1740_s6 }
  0x1e   : > { %v2152_v4 = vld [vmem:[%s2415_s13] sm:$0xff]   ;;  %v2155_v6 = vld [vmem:[%s2415_s13 + $0x8] sm:$0xff]   ;;  %v2157_v8 = vld [vmem:[%s2415_s13 + $0x10] sm:$0xff]   ;;  %s2169_s18 = scalar_lea.vmem %s2550_s7, 2048 }
  0x1f   : > { %v2153_v5 = vld [vmem:[%s2415_s13 + $0x60] sm:$0xff]   ;;  %1504 = vmatmul.mubr.msk.bf16.vlgmr.msra.gmra.mrb[0].mxu0 %vm384_vm0, %v2152_v4  ;;  %v2156_v7 = vld [vmem:[%s2415_s13 + $0x68] sm:$0xff]   ;;  %v2158_v9 = vld [vmem:[%s2415_s13 + $0x70] sm:$0xff]   ;;  %p2170_p12 = scmp.ne.s32.totalorder %s2550_s7, %s2169_s18 }
  0x20   : > { %1516 = vmatmul.mubr.msk.bf16.vlgmr.msra.gmra.mrb[0].mxu1 %vm384_vm0, %v2153_v5  ;;  %475 = vmatprep.mubr.bf16.mxu0 %v2309_v2  ;;  %v2159_v10 = vld [vmem:[%s2415_s13 + $0x18] sm:$0xff]   ;;  %v2161_v12 = vld [vmem:[%s2415_s13 + $0x20] sm:$0xff]   ;;  %v2162_v13 = vld [vmem:[%s2415_s13 + $0x28] sm:$0xff]  }
  0x21   : > { %2046 = vmatpush3.bf16.msra.mxu1 %v2154_v3  ;;  %595 = vmatprep.mubr.bf16.mxu1 %v2309_v2  ;;  %v2160_v11 = vld [vmem:[%s2415_s13 + $0x78] sm:$0xff]   ;;  %v2163_v14 = vld [vmem:[%s2415_s13 + $0x30] sm:$0xff]   ;;  %v2165_v16 = vld [vmem:[%s2415_s13 + $0x40] sm:$0xff]   ;;  %p2171_p13 = pnand %p2170_p12, %p2382_p4 }
  0x22   : > { %v2164_v15 = vld [vmem:[%s2415_s13 + $0x38] sm:$0xff]   ;;  %v2166_v17 = vld [vmem:[%s2415_s13 + $0x48] sm:$0xff]   ;;  %v2167_v18 = vld [vmem:[%s2415_s13 + $0x50] sm:$0xff]  }
  0x23   : > { %v2168_v19 = vld [vmem:[%s2415_s13 + $0x58] sm:$0xff]   ;;  %s2555_s13 = scalar_lea.hbm %s2679_s3, %s1740_s6  ;;  %p2172_p0 = pneg %p2171_p13 }
  0x27   : > { %1505 = vmatmul.mubr.msk.bf16.gmra.mrb[4].mxu0 %vm384_vm0, %v2155_v6 }
  0x28   : > { %1517 = vmatmul.mubr.msk.bf16.gmra.mrb[4].mxu1 %vm384_vm0, %v2156_v7  ;;  %485 = vmatprep.mubr.bf16.mxu0 %v2309_v2 }
  0x29   : > { %605 = vmatprep.mubr.bf16.mxu1 %v2309_v2 }
  0x2f   : > { %1506 = vmatmul.mubr.msk.bf16.gmra.mrb[8].mxu0 %vm384_vm0, %v2157_v8 }
  0x30   : > { %1518 = vmatmul.mubr.msk.bf16.gmra.mrb[8].mxu1 %vm384_vm0, %v2158_v9  ;;  %495 = vmatprep.mubr.bf16.mxu0 %v2309_v2 }
  0x31   : > { %615 = vmatprep.mubr.bf16.mxu1 %v2309_v2 }
  0x37   : > { %1507 = vmatmul.mubr.msk.bf16.gmra.mrb[12].mxu0 %vm384_vm0, %v2159_v10 }
  0x38   : > { %1519 = vmatmul.mubr.msk.bf16.gmra.mrb[12].mxu1 %vm384_vm0, %v2160_v11  ;;  %505 = vmatprep.mubr.bf16.mxu0 %v2309_v2 }
  0x39   : > { %2047 = vmatprep.mubr.msk.bf16.mxu1 %vm384_vm0, %v2152_v4 }
  0x3f   : > { %1508 = vmatmul.mubr.msk.bf16.gmra.mrb[16].mxu0 %vm384_vm0, %v2161_v12 }
  0x40   : > { %2048 = vmatmul.mubr.msk.bf16.vlgmr.msra.gmra.mrb[16].mxu1 %vm384_vm0, %v2155_v6  ;;  %515 = vmatprep.mubr.bf16.mxu0 %v2309_v2 }
  0x41   : > { %2051 = vmatprep.mubr.msk.bf16.mxu1 %vm384_vm0, %v2157_v8 }
  0x47   : > { %1509 = vmatmul.mubr.msk.bf16.gmra.mrb[20].mxu0 %vm384_vm0, %v2162_v13 }
  0x48   : > { %2052 = vmatmul.mubr.msk.bf16.gmra.mrb[20].mxu1 %vm384_vm0, %v2159_v10  ;;  %525 = vmatprep.mubr.bf16.mxu0 %v2309_v2 }
  0x49   : > { %2055 = vmatprep.mubr.msk.bf16.mxu1 %vm384_vm0, %v2161_v12 }
  0x4f   : > { %1510 = vmatmul.mubr.msk.bf16.gmra.mrb[24].mxu0 %vm384_vm0, %v2163_v14 }
  0x50   : > { %2056 = vmatmul.mubr.msk.bf16.gmra.mrb[24].mxu1 %vm384_vm0, %v2162_v13  ;;  %535 = vmatprep.mubr.bf16.mxu0 %v2309_v2 }
  0x51   : > { %2059 = vmatprep.mubr.msk.bf16.mxu1 %vm384_vm0, %v2163_v14 }
  0x57   : > { %1511 = vmatmul.mubr.msk.bf16.gmra.mrb[28].mxu0 %vm384_vm0, %v2164_v15 }
  0x58   : > { %2060 = vmatmul.mubr.msk.bf16.gmra.mrb[28].mxu1 %vm384_vm0, %v2164_v15  ;;  %545 = vmatprep.mubr.bf16.mxu0 %v2309_v2 }
  0x59   : > { %2063 = vmatprep.mubr.msk.bf16.mxu1 %vm384_vm0, %v2165_v16 }
  0x5f   : > { %1512 = vmatmul.mubr.msk.bf16.gmra.mrb[32].mxu0 %vm384_vm0, %v2165_v16 }
  0x60   : > { %2064 = vmatmul.mubr.msk.bf16.gmra.mrb[32].mxu1 %vm384_vm0, %v2166_v17  ;;  %555 = vmatprep.mubr.bf16.mxu0 %v2309_v2 }
  0x61   : > { %2067 = vmatprep.mubr.msk.bf16.mxu1 %vm384_vm0, %v2167_v18 }
  0x67   : > { %1513 = vmatmul.mubr.msk.bf16.gmra.mrb[36].mxu0 %vm384_vm0, %v2166_v17 }
  0x68   : > { %2068 = vmatmul.mubr.msk.bf16.gmra.mrb[36].mxu1 %vm384_vm0, %v2168_v19  ;;  %565 = vmatprep.mubr.bf16.mxu0 %v2309_v2 }
  0x69   : > { %2071 = vmatprep.mubr.msk.bf16.mxu1 %vm384_vm0, %v2153_v5 }
  0x6f   : > { %1514 = vmatmul.mubr.msk.bf16.gmra.mrb[40].mxu0 %vm384_vm0, %v2167_v18 }
  0x70   : > { %2072 = vmatmul.mubr.msk.bf16.gmra.mrb[40].mxu1 %vm384_vm0, %v2156_v7  ;;  %575 = vmatprep.mubr.bf16.mxu0 %v2309_v2 }
  0x71   : > { %2075 = vmatprep.mubr.msk.bf16.mxu1 %vm384_vm0, %v2158_v9 }
  0x77   : > { %1515 = vmatmul.mubr.msk.bf16.gmra.mrb[44].mxu0 %vm384_vm0, %v2168_v19 }
  0x78   : > { %2076 = vmatmul.mubr.msk.bf16.gmra.mrb[44].mxu1 %vm384_vm0, %v2160_v11 }
  0xf2   : > { %v467_v20 = vpop.f32.mrb[0].mxu0 }
  0xf3   : > { %v587_v21 = vpop.f32.mrb[0].mxu1  ;;  %v469_v22 = vpop.f32.mrb[1].mxu0 }
  0xf4   : > { %v589_v23 = vpop.f32.mrb[1].mxu1  ;;  %v471_v24 = vpop.f32.mrb[2].mxu0 }
  0xf5   : > { %v1746_v25 = vpack.c.bf16 %v471_v24, %v467_v20  ;;  %v591_v26 = vpop.f32.mrb[2].mxu1  ;;  %v473_v27 = vpop.f32.mrb[3].mxu0 }
  0xf6   : > { %v1806_v28 = vpack.c.bf16 %v591_v26, %v587_v21  ;;  %v1826_v29 = vpack.c.bf16 %v473_v27, %v469_v22  ;;  %v593_v30 = vpop.f32.mrb[3].mxu1 }
  0xf7   : > { %1747 = vst [vmem:[%s2485_s26] sm:$0xff] %v1746_v25   ;;  %v1886_v31 = vpack.c.bf16 %v593_v30, %v589_v23 }
  0xf8   : > { %1994 = vst [vmem:[%s2485_s26 + $0x60] sm:$0xff] %v1806_v28   ;;  %1827 = vst [vmem:[%s2490_s29] sm:$0xff] %v1826_v29  }
  0xf9   : > { %2009 = vst [vmem:[%s2490_s29 + $0x60] sm:$0xff] %v1886_v31  }
  0xfa   : > { %v477_v32 = vpop.f32.mrb[4].mxu0 }
  0xfb   : > { %v597_v33 = vpop.f32.mrb[4].mxu1  ;;  %v479_v34 = vpop.f32.mrb[5].mxu0 }
  0xfc   : > { %v599_v35 = vpop.f32.mrb[5].mxu1  ;;  %v481_v36 = vpop.f32.mrb[6].mxu0 }
  0xfd   : > { %v1751_v37 = vpack.c.bf16 %v481_v36, %v477_v32  ;;  %v601_v38 = vpop.f32.mrb[6].mxu1  ;;  %v483_v39 = vpop.f32.mrb[7].mxu0 }
  0xfe   : > { %v1811_v40 = vpack.c.bf16 %v601_v38, %v597_v33  ;;  %v1831_v41 = vpack.c.bf16 %v483_v39, %v479_v34  ;;  %v603_v42 = vpop.f32.mrb[7].mxu1 }
  0xff   : > { %1983 = vst [vmem:[%s2485_s26 + $0x8] sm:$0xff] %v1751_v37   ;;  %v1891_v43 = vpack.c.bf16 %v603_v42, %v599_v35 }
 0x100   : > { %1995 = vst [vmem:[%s2485_s26 + $0x68] sm:$0xff] %v1811_v40   ;;  %1998 = vst [vmem:[%s2490_s29 + $0x8] sm:$0xff] %v1831_v41  }
 0x101   : > { %2010 = vst [vmem:[%s2490_s29 + $0x68] sm:$0xff] %v1891_v43  }
 0x102   : > { %v487_v44 = vpop.f32.mrb[8].mxu0 }
 0x103   : > { %v607_v45 = vpop.f32.mrb[8].mxu1  ;;  %v489_v46 = vpop.f32.mrb[9].mxu0 }
 0x104   : > { %v609_v47 = vpop.f32.mrb[9].mxu1  ;;  %v491_v48 = vpop.f32.mrb[10].mxu0 }
 0x105   : > { %v1756_v49 = vpack.c.bf16 %v491_v48, %v487_v44  ;;  %v611_v50 = vpop.f32.mrb[10].mxu1  ;;  %v493_v51 = vpop.f32.mrb[11].mxu0 }
 0x106   : > { %v1816_v52 = vpack.c.bf16 %v611_v50, %v607_v45  ;;  %v1836_v53 = vpack.c.bf16 %v493_v51, %v489_v46  ;;  %v613_v54 = vpop.f32.mrb[11].mxu1 }
 0x107   : > { %1984 = vst [vmem:[%s2485_s26 + $0x10] sm:$0xff] %v1756_v49   ;;  %v1896_v55 = vpack.c.bf16 %v613_v54, %v609_v47 }
 0x108   : > { %1996 = vst [vmem:[%s2485_s26 + $0x70] sm:$0xff] %v1816_v52   ;;  %1999 = vst [vmem:[%s2490_s29 + $0x10] sm:$0xff] %v1836_v53  }
 0x109   : > { %2011 = vst [vmem:[%s2490_s29 + $0x70] sm:$0xff] %v1896_v55  }
 0x10a   : > { %v497_v56 = vpop.f32.mrb[12].mxu0 }
 0x10b   : > { %v617_v57 = vpop.f32.mrb[12].mxu1  ;;  %v499_v58 = vpop.f32.mrb[13].mxu0 }
 0x10c   : > { %v619_v59 = vpop.f32.mrb[13].mxu1  ;;  %v501_v60 = vpop.f32.mrb[14].mxu0 }
 0x10d   : > { %v1761_v61 = vpack.c.bf16 %v501_v60, %v497_v56  ;;  %v621_v62 = vpop.f32.mrb[14].mxu1  ;;  %v503_v63 = vpop.f32.mrb[15].mxu0 }
 0x10e   : > { %v1821_v0 = vpack.c.bf16 %v621_v62, %v617_v57  ;;  %v1841_v1 = vpack.c.bf16 %v503_v63, %v499_v58  ;;  %v623_v2 = vpop.f32.mrb[15].mxu1 }
 0x10f   : > { %1985 = vst [vmem:[%s2485_s26 + $0x18] sm:$0xff] %v1761_v61   ;;  %v1901_v3 = vpack.c.bf16 %v623_v2, %v619_v59 }
 0x110   : > { %1997 = vst [vmem:[%s2485_s26 + $0x78] sm:$0xff] %v1821_v0   ;;  %2000 = vst [vmem:[%s2490_s29 + $0x18] sm:$0xff] %v1841_v1  }
 0x111   : > { %2012 = vst [vmem:[%s2490_s29 + $0x78] sm:$0xff] %v1901_v3  }
 0x112   : > { %v507_v4 = vpop.f32.mrb[16].mxu0 }
 0x113   : > { %v2049_v5 = vpop.f32.mrb[16].mxu1  ;;  %v509_v6 = vpop.f32.mrb[17].mxu0 }
 0x114   : > { %v660_v7 = vpop.f32.mrb[17].mxu1  ;;  %v511_v8 = vpop.f32.mrb[18].mxu0 }
 0x115   : > { %v1766_v9 = vpack.c.bf16 %v511_v8, %v507_v4  ;;  %v2050_v10 = vpop.f32.mrb[18].mxu1  ;;  %v513_v11 = vpop.f32.mrb[19].mxu0 }
 0x116   : > { %v1911_v12 = vpack.c.bf16 %v2050_v10, %v2049_v5  ;;  %v1846_v13 = vpack.c.bf16 %v513_v11, %v509_v6  ;;  %v663_v14 = vpop.f32.mrb[19].mxu1 }
 0x117   : > { %1986 = vst [vmem:[%s2485_s26 + $0x20] sm:$0xff] %v1766_v9   ;;  %v1906_v15 = vpack.c.bf16 %v663_v14, %v660_v7 }
 0x118   : > { %2013 = vst [vmem:[%s2508_s30 + $0x8] sm:$0xff] %v1911_v12   ;;  %2001 = vst [vmem:[%s2490_s29 + $0x20] sm:$0xff] %v1846_v13  }
 0x119   : > { %1907 = vst [vmem:[%s2508_s30] sm:$0xff] %v1906_v15  }
 0x11a   : > { %v517_v16 = vpop.f32.mrb[20].mxu0 }
 0x11b   : > { %v2053_v17 = vpop.f32.mrb[20].mxu1  ;;  %v519_v18 = vpop.f32.mrb[21].mxu0 }
 0x11c   : > { %v676_v19 = vpop.f32.mrb[21].mxu1  ;;  %v521_v20 = vpop.f32.mrb[22].mxu0 }
 0x11d   : > { %v1771_v21 = vpack.c.bf16 %v521_v20, %v517_v16  ;;  %v2054_v22 = vpop.f32.mrb[22].mxu1  ;;  %v523_v23 = vpop.f32.mrb[23].mxu0 }
 0x11e   : > { %v1921_v24 = vpack.c.bf16 %v2054_v22, %v2053_v17  ;;  %v1851_v25 = vpack.c.bf16 %v523_v23, %v519_v18  ;;  %v679_v26 = vpop.f32.mrb[23].mxu1 }
 0x11f   : > { %1987 = vst [vmem:[%s2485_s26 + $0x28] sm:$0xff] %v1771_v21   ;;  %v1916_v27 = vpack.c.bf16 %v679_v26, %v676_v19 }
 0x120   : > { %2015 = vst [vmem:[%s2508_s30 + $0x18] sm:$0xff] %v1921_v24   ;;  %2002 = vst [vmem:[%s2490_s29 + $0x28] sm:$0xff] %v1851_v25  }
 0x121   : > { %2014 = vst [vmem:[%s2508_s30 + $0x10] sm:$0xff] %v1916_v27  }
 0x122   : > { %v527_v28 = vpop.f32.mrb[24].mxu0 }
 0x123   : > { %v2057_v29 = vpop.f32.mrb[24].mxu1  ;;  %v529_v30 = vpop.f32.mrb[25].mxu0 }
 0x124   : > { %v692_v31 = vpop.f32.mrb[25].mxu1  ;;  %v531_v32 = vpop.f32.mrb[26].mxu0 }
 0x125   : > { %v1776_v33 = vpack.c.bf16 %v531_v32, %v527_v28  ;;  %v2058_v34 = vpop.f32.mrb[26].mxu1  ;;  %v533_v35 = vpop.f32.mrb[27].mxu0 }
 0x126   : > { %v1931_v36 = vpack.c.bf16 %v2058_v34, %v2057_v29  ;;  %v1856_v37 = vpack.c.bf16 %v533_v35, %v529_v30  ;;  %v695_v38 = vpop.f32.mrb[27].mxu1 }
 0x127   : > { %1988 = vst [vmem:[%s2485_s26 + $0x30] sm:$0xff] %v1776_v33   ;;  %v1926_v39 = vpack.c.bf16 %v695_v38, %v692_v31 }
 0x128   : > { %2017 = vst [vmem:[%s2508_s30 + $0x28] sm:$0xff] %v1931_v36   ;;  %2003 = vst [vmem:[%s2490_s29 + $0x30] sm:$0xff] %v1856_v37  }
 0x129   : > { %2016 = vst [vmem:[%s2508_s30 + $0x20] sm:$0xff] %v1926_v39  }
 0x12a   : > { %v537_v40 = vpop.f32.mrb[28].mxu0 }
 0x12b   : > { %v2061_v41 = vpop.f32.mrb[28].mxu1  ;;  %v539_v42 = vpop.f32.mrb[29].mxu0 }
 0x12c   : > { %v708_v43 = vpop.f32.mrb[29].mxu1  ;;  %v541_v44 = vpop.f32.mrb[30].mxu0 }
 0x12d   : > { %v1781_v45 = vpack.c.bf16 %v541_v44, %v537_v40  ;;  %v2062_v46 = vpop.f32.mrb[30].mxu1  ;;  %v543_v47 = vpop.f32.mrb[31].mxu0 }
 0x12e   : > { %v1941_v48 = vpack.c.bf16 %v2062_v46, %v2061_v41  ;;  %v1861_v49 = vpack.c.bf16 %v543_v47, %v539_v42  ;;  %v711_v50 = vpop.f32.mrb[31].mxu1 }
 0x12f   : > { %1989 = vst [vmem:[%s2485_s26 + $0x38] sm:$0xff] %v1781_v45   ;;  %v1936_v51 = vpack.c.bf16 %v711_v50, %v708_v43 }
 0x130   : > { %2019 = vst [vmem:[%s2508_s30 + $0x38] sm:$0xff] %v1941_v48   ;;  %2004 = vst [vmem:[%s2490_s29 + $0x38] sm:$0xff] %v1861_v49  }
 0x131   : > { %2018 = vst [vmem:[%s2508_s30 + $0x30] sm:$0xff] %v1936_v51  }
 0x132   : > { %v547_v52 = vpop.f32.mrb[32].mxu0 }
 0x133   : > { %v2065_v53 = vpop.f32.mrb[32].mxu1  ;;  %v549_v54 = vpop.f32.mrb[33].mxu0 }
 0x134   : > { %v724_v55 = vpop.f32.mrb[33].mxu1  ;;  %v551_v56 = vpop.f32.mrb[34].mxu0 }
 0x135   : > { %v1786_v57 = vpack.c.bf16 %v551_v56, %v547_v52  ;;  %v2066_v58 = vpop.f32.mrb[34].mxu1  ;;  %v553_v59 = vpop.f32.mrb[35].mxu0 }
 0x136   : > { %v1951_v60 = vpack.c.bf16 %v2066_v58, %v2065_v53  ;;  %v1866_v61 = vpack.c.bf16 %v553_v59, %v549_v54  ;;  %v727_v62 = vpop.f32.mrb[35].mxu1 }
 0x137   : > { %1990 = vst [vmem:[%s2485_s26 + $0x40] sm:$0xff] %v1786_v57   ;;  %v1946_v63 = vpack.c.bf16 %v727_v62, %v724_v55 }
 0x138   : > { %2021 = vst [vmem:[%s2508_s30 + $0x48] sm:$0xff] %v1951_v60   ;;  %2005 = vst [vmem:[%s2490_s29 + $0x40] sm:$0xff] %v1866_v61  }
 0x139   : > { %2020 = vst [vmem:[%s2508_s30 + $0x40] sm:$0xff] %v1946_v63  }
 0x13a   : > { %v557_v0 = vpop.f32.mrb[36].mxu0 }
 0x13b   : > { %v2069_v1 = vpop.f32.mrb[36].mxu1  ;;  %v559_v2 = vpop.f32.mrb[37].mxu0 }
 0x13c   : > { %v740_v3 = vpop.f32.mrb[37].mxu1  ;;  %v561_v4 = vpop.f32.mrb[38].mxu0 }
 0x13d   : > { %v1791_v5 = vpack.c.bf16 %v561_v4, %v557_v0  ;;  %v2070_v6 = vpop.f32.mrb[38].mxu1  ;;  %v563_v7 = vpop.f32.mrb[39].mxu0 }
 0x13e   : > { %v1961_v8 = vpack.c.bf16 %v2070_v6, %v2069_v1  ;;  %v1871_v9 = vpack.c.bf16 %v563_v7, %v559_v2  ;;  %v743_v10 = vpop.f32.mrb[39].mxu1 }
 0x13f   : > { %1991 = vst [vmem:[%s2485_s26 + $0x48] sm:$0xff] %v1791_v5   ;;  %v1956_v11 = vpack.c.bf16 %v743_v10, %v740_v3 }
 0x140   : > { %2023 = vst [vmem:[%s2508_s30 + $0x58] sm:$0xff] %v1961_v8   ;;  %2006 = vst [vmem:[%s2490_s29 + $0x48] sm:$0xff] %v1871_v9  }
 0x141   : > { %2022 = vst [vmem:[%s2508_s30 + $0x50] sm:$0xff] %v1956_v11  }
 0x142   : > { %v567_v12 = vpop.f32.mrb[40].mxu0 }
 0x143   : > { %v2073_v13 = vpop.f32.mrb[40].mxu1  ;;  %v569_v14 = vpop.f32.mrb[41].mxu0 }
 0x144   : > { %v756_v15 = vpop.f32.mrb[41].mxu1  ;;  %v571_v16 = vpop.f32.mrb[42].mxu0 }
 0x145   : > { %v1796_v17 = vpack.c.bf16 %v571_v16, %v567_v12  ;;  %v2074_v18 = vpop.f32.mrb[42].mxu1  ;;  %v573_v19 = vpop.f32.mrb[43].mxu0 }
 0x146   : > { %v1971_v20 = vpack.c.bf16 %v2074_v18, %v2073_v13  ;;  %v1876_v21 = vpack.c.bf16 %v573_v19, %v569_v14  ;;  %v759_v22 = vpop.f32.mrb[43].mxu1 }
 0x147   : > { %1992 = vst [vmem:[%s2485_s26 + $0x50] sm:$0xff] %v1796_v17   ;;  %v1966_v23 = vpack.c.bf16 %v759_v22, %v756_v15 }
 0x148   : > { %2025 = vst [vmem:[%s2508_s30 + $0x68] sm:$0xff] %v1971_v20   ;;  %2007 = vst [vmem:[%s2490_s29 + $0x50] sm:$0xff] %v1876_v21  }
 0x149   : > { %2024 = vst [vmem:[%s2508_s30 + $0x60] sm:$0xff] %v1966_v23  }
 0x14a   : > { %v577_v24 = vpop.f32.mrb[44].mxu0 }
 0x14b   : > { %v2077_v25 = vpop.f32.mrb[44].mxu1  ;;  %v579_v26 = vpop.f32.mrb[45].mxu0 }
 0x14c   : > { %v772_v27 = vpop.f32.mrb[45].mxu1  ;;  %v581_v28 = vpop.f32.mrb[46].mxu0 }
 0x14d   : > { %v1801_v29 = vpack.c.bf16 %v581_v28, %v577_v24  ;;  %v2078_v30 = vpop.f32.mrb[46].mxu1  ;;  %v583_v31 = vpop.f32.mrb[47].mxu0 }
 0x14e   : > { %v1981_v32 = vpack.c.bf16 %v2078_v30, %v2077_v25  ;;  %v1881_v33 = vpack.c.bf16 %v583_v31, %v579_v26  ;;  %v775_v34 = vpop.f32.mrb[47].mxu1 }
 0x14f   : > { %1993 = vst [vmem:[%s2485_s26 + $0x58] sm:$0xff] %v1801_v29   ;;  %v1976_v35 = vpack.c.bf16 %v775_v34, %v772_v27  ;;  %s2173_s26 = sshll.u32 %s2310_s12, 4  ;;  %s2174_s26 = int_to_ptr.vmem [resolvable:$false] %s2173_s26 }
 0x150   : > { %2027 = vst [vmem:[%s2508_s30 + $0x78] sm:$0xff] %v1981_v32   ;;  %2008 = vst [vmem:[%s2490_s29 + $0x58] sm:$0xff] %v1881_v33   ;;  %s2175_s0 = scalar_lea.vmem %s2174_s26, 4096  ;;  %p2176_p1 = scmp.lt.s32.totalorder %s2550_s7, %s2174_s26 }
 0x151   : > { %p2177_p2 = scmp.lt.s32.totalorder %s2175_s0, %s2169_s18 }
 0x153   : > { %p2178_p3 = por %p2177_p2, %p2176_p1 }
 0x155   : > { %p2179_p5 = pnand %p2178_p3, %p2172_p0 }
 0x157   : > { %2182 = shalt.err (!%p2179_p5)
}
 0x158   : > { %s2183_s14 = scalar_lea.hbm %s2548_s11, 2048  ;;  %s2187_s24 = scalar_lea.hbm %s2678_s2, 4096 }
 0x159   : > { %p2184_p6 = scmp.ne.s32.totalorder %s2548_s11, %s2183_s14  ;;  %p2188_p10 = scmp.lt.u32.totalorder %s2548_s11, %s2678_s2 }
 0x15a   : > { %p2189_p11 = scmp.lt.u32.totalorder %s2187_s24, %s2183_s14  ;;  %p2191_p13 = scmp.lt.u32.totalorder %s2183_s14, %s2548_s11 }
 0x15b   : > { %p2185_p7 = pnand %p2184_p6, %p2382_p4 }
 0x15c   : > { %p2190_p12 = por %p2189_p11, %p2188_p10 }
 0x15d   : > { %p2186_p9 = pneg %p2185_p7 }
 0x15e   : > { %p2192_p0 = por %p2191_p13, %p2190_p12 }
 0x160   : > { %p2193_p1 = pnand %p2192_p0, %p2186_p9 }
 0x162   : > { %2196 = shalt.err (!%p2193_p1)
}
 0x163   : > { %s2311_s0 = smov 64   ;;  %s2312_s18 = smov 4   ;;  %2026 = vst [vmem:[%s2508_s30 + $0x70] sm:$0xff] %v1976_v35  }
 0x164   : > { %2081 = dma.vmem_to_hbm [thread:$0]  (%p2382_p4), %s2550_s7, 2048, %s2548_s11, %s2571_s22, %s2311_s0, %s2311_s0, %s2312_s18  }
 0x165   : > { %s1273_s26 = scalar_lea.sflag [#allocation5], %s2536_s5  ;;  %s2197_s14 = scalar_lea.vmem %s2557_s8, 2048 }
 0x166   : > { %p2198_p2 = scmp.ne.s32.totalorder %s2557_s8, %s2197_s14  ;;  %s2313_s29 = smov [#allocation4]  }
 0x167   : > { %s2201_s6 = sshll.u32 %s2313_s29, 4  ;;  %s2202_s6 = int_to_ptr.vmem [resolvable:$false] %s2201_s6 }
 0x168   : > { %p2199_p3 = pnand %p2198_p2, %p2382_p4  ;;  %s2203_s24 = scalar_lea.vmem %s2202_s6, 4096 }
 0x169   : > { %p2204_p6 = scmp.lt.s32.totalorder %s2557_s8, %s2202_s6  ;;  %p2205_p7 = scmp.lt.s32.totalorder %s2203_s24, %s2197_s14 }
 0x16a   : > { %p2200_p5 = pneg %p2199_p3 }
 0x16b   : > { %p2206_p9 = por %p2205_p7, %p2204_p6 }
 0x16d   : > { %p2207_p10 = pnand %p2206_p9, %p2200_p5 }
 0x16f   : > { %2210 = shalt.err (!%p2207_p10)
}
 0x170   : > { %s2211_s22 = scalar_lea.hbm %s2555_s13, 2048  ;;  %s2215_s11 = scalar_lea.hbm %s2679_s3, 4096 }
 0x171   : > { %p2212_p11 = scmp.ne.s32.totalorder %s2555_s13, %s2211_s22  ;;  %p2216_p0 = scmp.lt.u32.totalorder %s2555_s13, %s2679_s3 }
 0x172   : > { %p2217_p1 = scmp.lt.u32.totalorder %s2215_s11, %s2211_s22  ;;  %p2219_p3 = scmp.lt.u32.totalorder %s2211_s22, %s2555_s13 }
 0x173   : > { %p2213_p12 = pnand %p2212_p11, %p2382_p4 }
 0x174   : > { %p2218_p2 = por %p2217_p1, %p2216_p0 }
 0x175   : > { %p2214_p13 = pneg %p2213_p12 }
 0x176   : > { %p2220_p5 = por %p2219_p3, %p2218_p2 }
 0x178   : > { %p2221_p6 = pnand %p2220_p5, %p2214_p13 }
 0x17a   : > { %2224 = shalt.err (!%p2221_p6)
}
 0x17b   : > { %2082 = dma.vmem_to_hbm [thread:$0]  (%p2382_p4), %s2557_s8, 2048, %s2555_s13, %s1273_s26, %s2311_s0, %s2311_s0, %s2312_s18  }
 0x17c   : > { %s2225_s14 = scalar_lea.vmem %s2565_s9, 2048  ;;  %s2314_s29 = smov [#allocation6]  }
 0x17d   : > { %p2226_p7 = scmp.ne.s32.totalorder %s2565_s9, %s2225_s14  ;;  %s2229_s6 = sshll.u32 %s2314_s29, 4  ;;  %s2230_s6 = int_to_ptr.vmem [resolvable:$false] %s2229_s6 }
 0x17e   : > { %s2231_s24 = scalar_lea.vmem %s2230_s6, 4096  ;;  %p2232_p11 = scmp.lt.s32.totalorder %s2565_s9, %s2230_s6 }
 0x17f   : > { %p2227_p9 = pnand %p2226_p7, %p2382_p4  ;;  %p2233_p12 = scmp.lt.s32.totalorder %s2231_s24, %s2225_s14 }
 0x181   : > { %p2228_p10 = pneg %p2227_p9  ;;  %p2234_p13 = por %p2233_p12, %p2232_p11 }
 0x183   : > { %p2235_p0 = pnand %p2234_p13, %p2228_p10 }
 0x185   : > { %2238 = shalt.err (!%p2235_p0)
}
 0x186   : > { %s2239_s8 = scalar_lea.hbm %s2563_s10, 2048  ;;  %s2243_s30 = scalar_lea.hbm %s2680_s4, 4096 }
 0x187   : > { %p2240_p1 = scmp.ne.s32.totalorder %s2563_s10, %s2239_s8  ;;  %p2244_p5 = scmp.lt.u32.totalorder %s2563_s10, %s2680_s4 }
 0x188   : > { %p2245_p6 = scmp.lt.u32.totalorder %s2243_s30, %s2239_s8  ;;  %p2247_p9 = scmp.lt.u32.totalorder %s2239_s8, %s2563_s10 }
 0x189   : > { %p2241_p2 = pnand %p2240_p1, %p2382_p4 }
 0x18a   : > { %p2246_p7 = por %p2245_p6, %p2244_p5 }
 0x18b   : > { %p2242_p3 = pneg %p2241_p2 }
 0x18c   : > { %p2248_p10 = por %p2247_p9, %p2246_p7 }
 0x18e   : > { %p2249_p11 = pnand %p2248_p10, %p2242_p3 }
 0x190   : > { %2252 = shalt.err (!%p2249_p11)
}
 0x191   : > { %2083 = dma.vmem_to_hbm [thread:$0]  (%p2382_p4), %s2565_s9, 2048, %s2563_s10, %s1273_s26, %s2311_s0, %s2311_s0, %s2312_s18  }
 0x192 PF: > { %p2097_p12 = scmp.ge.s32.totalorder %s2307_s20, 2  ;;  %s1344_s21 = sand.u32 1, %s2287_s15  }
 0x193   : > { %s1345_s12 = scalar_lea.sflag [#allocation3], %s1344_s21 }
 0x194   : > { %p2088_p13 = pnand %p2097_p12, %p2391_p8 }
 0x196   : > { %2278 = dma.done.wait (!%p2088_p13), %s1345_s12, 2048  }
 0x197   : > { %2280 = vsyncadd (!%p2088_p13), %s1345_s12, 4294965248  ;;  %s2686_s25 = sadd.s32 4294967294, %s2307_s20  }
 0x198   : > { %s1353_s14 = sand.u32 1, %s2686_s25  }
 0x199   : > { %s1354_s29 = scalar_lea.sflag [#allocation5], %s1353_s14 }
 0x19a   : > { %2282 = dma.done.wait (!%p2088_p13), %s1354_s29, 4096  }
 0x19b   : > { %2284 = vsyncadd (!%p2088_p13), %s1354_s29, 4294963200  ;;  %s21_s20 = sadd.s32 1, %s2307_s20   ;;  %s2687_s15 = smov %s2291_s16 }
 0x19c   : > { %p18_p4 = scmp.ge.s32.totalorder %s21_s20, 4   ;;  %s2688_s16 = smov %s2295_s17 }
 0x19d   : > { %s2689_s17 = smov %s2397_s28  ;;  %s2690_s18 = smov %s2303_s19 }
 0x19e   : > { %s2691_s19 = smov %s2693_s23  ;;  %20 = sbr.rel (!%p18_p4) target bundleno = 8 (0x8), region = 95 }
 0x1a5   :  { %1368 = vsyncpa [#allocation3], 1 }
 0x1a6   :  { %1370 = vsyncpa [#allocation3 + $0x1], 1 }
 0x1a7   :  { %1371 = vsyncpa [#allocation5], 1 }
 0x1a8   :  { %1373 = vsyncpa [#allocation5 + $0x1], 1 }

</bundles_post_ra>
